<compile_context>
chip_gen: v7x
topology: tpu7x:2x2x1
jax: 0.10.0
libtpu: 0.0.40
codegen_flags: <defaults>
</compile_context>

<pallas_src>
import functools

import jax
import jax.numpy as jnp
from jax.experimental import pallas as pl
from jax.experimental.pallas import tpu as pltpu


# Conservative per-kernel VMEM budget: fits v7x (64 MiB/TC) with ~25% headroom
# and is well inside v5e/v6e's 128 MiB.
_VMEM_BUDGET = 48 * 1024 * 1024


def _round_up(x, m):
    return ((x + m - 1) // m) * m


def _lora_kernel_carry(x_ref, wt_ref, b_ref, at_ref, bt_ref, o_ref,
                       acc_ref, z_ref, *, tk, x_panel):
    # x_ref:   (tm, k_pad) or (tm, tk)  bf16 input panel / tile
    # wt_ref:  (tk, tn)                 bf16 base weight tile (in x out)
    # b_ref:   (1,  tn)                 f32  bias tile
    # at_ref:  (tk, r_pad)              bf16 LoRA A tile (transposed, padded)
    # bt_ref:  (r_pad, tn)              bf16 LoRA B tile (transposed, padded)
    # o_ref:   (tm, tn)                 output tile
    # acc_ref: (tm, tn)   f32 scratch — base matmul accumulator over K
    # z_ref:   (tm, r_pad) f32 scratch — x @ A^T accumulator over K (j==0 only)
    j = pl.program_id(1)
    k = pl.program_id(2)
    nk = pl.num_programs(2)

    @pl.when(k == 0)
    def _init_acc():
        acc_ref[...] = jnp.zeros_like(acc_ref)

    @pl.when(jnp.logical_and(j == 0, k == 0))
    def _init_z():
        z_ref[...] = jnp.zeros_like(z_ref)

    if x_panel:
        x = x_ref[:, pl.ds(pl.multiple_of(k * tk, tk), tk)]
    else:
        x = x_ref[...]

    acc_ref[...] += jnp.dot(x, wt_ref[...], preferred_element_type=jnp.float32)

    # z = x @ A^T depends only on (i, k): accumulate once per row tile
    # (while j == 0) and reuse the VMEM scratch for the remaining N tiles.
    @pl.when(j == 0)
    def _lora_a():
        z_ref[...] += jnp.dot(x, at_ref[...], preferred_element_type=jnp.float32)

    @pl.when(k == nk - 1)
    def _finalize():
        bt = bt_ref[...]
        lora = jnp.dot(z_ref[...].astype(bt.dtype), bt,
                       preferred_element_type=jnp.float32)
        o_ref[...] = (acc_ref[...] + b_ref[...] + lora).astype(o_ref.dtype)


def _lora_kernel_precomp(x_ref, wt_ref, b_ref, z_ref, bt_ref, o_ref,
                         acc_ref, *, tk, x_panel):
    # Small-M variant: z = x @ A^T is precomputed outside the kernel, so the
    # N axis carries no state and can be megacore-parallel.
    k = pl.program_id(2)
    nk = pl.num_programs(2)

    @pl.when(k == 0)
    def _init_acc():
        acc_ref[...] = jnp.zeros_like(acc_ref)

    if x_panel:
        x = x_ref[:, pl.ds(pl.multiple_of(k * tk, tk), tk)]
    else:
        x = x_ref[...]

    acc_ref[...] += jnp.dot(x, wt_ref[...], preferred_element_type=jnp.float32)

    @pl.when(k == nk - 1)
    def _finalize():
        lora = jnp.dot(z_ref[...], bt_ref[...],
                       preferred_element_type=jnp.float32)
        o_ref[...] = (acc_ref[...] + b_ref[...] + lora).astype(o_ref.dtype)


def prepare_lora_weights(w, b, a, bmat, *, tn=1024, tk=1024, rank_pad=128,
                         compute_dtype=jnp.bfloat16):
    """One-time ("load time") weight prep: transpose, zero-pad, cast.

    w: (out, in)  b: (out,)  a: (rank, in)  bmat: (out, rank)
    Returns (wt, b2, at, bt, meta) with meta = (out_f, in_f, tn_eff, tk_eff).
    Keep this OUT of the per-call jitted path (no per-call W transpose).
    """
    out_f, in_f = w.shape
    rank = a.shape[0]

    tn_eff = min(tn, _round_up(out_f, 128))
    tk_eff = min(tk, _round_up(in_f, 128))
    n_pad = _round_up(out_f, tn_eff)
    k_pad = _round_up(in_f, tk_eff)
    r_pad = _round_up(rank, rank_pad)

    wt = jnp.zeros((k_pad, n_pad), compute_dtype)
    wt = wt.at[:in_f, :out_f].set(w.T.astype(compute_dtype))
    at = jnp.zeros((k_pad, r_pad), compute_dtype)
    at = at.at[:in_f, :rank].set(a.T.astype(compute_dtype))
    bt = jnp.zeros((r_pad, n_pad), compute_dtype)
    bt = bt.at[:rank, :out_f].set(bmat.T.astype(compute_dtype))
    b2 = jnp.zeros((1, n_pad), jnp.float32)
    b2 = b2.at[0, :out_f].set(b.astype(jnp.float32))
    return wt, b2, at, bt, (out_f, in_f, tn_eff, tk_eff)


@functools.partial(jax.jit,
                   static_argnames=("out_f", "in_f", "tm", "tn", "tk",
                                    "out_dtype"))
def lora_apply(x, wt, b2, at, bt, *, out_f, in_f, tm=512, tn=1024, tk=1024,
               out_dtype=None):
    """x: (..., in_f) -> (..., out_f). Weights from prepare_lora_weights()."""
    assert x.shape[-1] == in_f
    lead = x.shape[:-1]
    x2 = x.reshape(-1, in_f)
    m = x2.shape[0]
    k_pad, n_pad = wt.shape
    r_pad = at.shape[1]
    compute_dtype = wt.dtype
    out_dtype = x.dtype if out_dtype is None else jnp.dtype(out_dtype)

    tn = min(tn, n_pad)
    tk = min(tk, k_pad)
    assert n_pad % tn == 0 and k_pad % tk == 0

    # bf16 blocks need >=16 sublanes; clamp the row tile to the problem size.
    tm_eff = min(tm, _round_up(m, 16))
    m_pad = _round_up(m, tm_eff)

    # Pad/cast x only when needed (skip the extra HBM pass otherwise).
    x2c = x2.astype(compute_dtype)
    if m_pad == m and k_pad == in_f:
        xp = x2c
    else:
        xp = jnp.pad(x2c, ((0, m_pad - m), (0, k_pad - in_f)))

    grid = (m_pad // tm_eff, n_pad // tn, k_pad // tk)
    nk = grid[2]

    # VMEM budget check: can we keep the whole (tm, K) x panel resident per
    # row tile (removes the tm/tn re-stream overhead of x)?
    isz = jnp.dtype(compute_dtype).itemsize
    osz = jnp.dtype(out_dtype).itemsize
    base_bytes = (2 * tk * tn * isz            # W^T tiles (double-buffered)
                  + 2 * tm_eff * tn * osz      # output tiles
                  + tm_eff * tn * 4            # f32 accumulator
                  + tm_eff * r_pad * 4         # z scratch / input
                  + 2 * r_pad * tn * isz       # B^T tiles
                  + 2 * tk * r_pad * isz       # A^T tiles
                  + 2 * tn * 4)                # bias
    x_panel = base_bytes + 2 * tm_eff * k_pad * isz <= _VMEM_BUDGET

    if x_panel:
        x_spec = pl.BlockSpec((tm_eff, k_pad), lambda i, j, k: (i, 0))
    else:
        x_spec = pl.BlockSpec((tm_eff, tk), lambda i, j, k: (i, k))

    wt_spec = pl.BlockSpec((tk, tn), lambda i, j, k: (k, j))
    b_spec = pl.BlockSpec((1, tn), lambda i, j, k: (0, j))
    bt_spec = pl.BlockSpec((r_pad, tn), lambda i, j, k: (0, j))

    if grid[0] == 1:
        # Small-M / decode path: precompute z = x @ A^T (tiny skinny matmul),
        # drop the in-kernel carry, and let both TensorCores split N.
        z = jnp.dot(xp, at,
                    preferred_element_type=jnp.float32).astype(compute_dtype)
        kernel = functools.partial(_lora_kernel_precomp, tk=tk, x_panel=x_panel)
        in_specs = [x_spec, wt_spec, b_spec,
                    pl.BlockSpec((tm_eff, r_pad), lambda i, j, k: (i, 0)),
                    bt_spec]
        operands = (xp, wt, b2, z, bt)
        scratch = [pltpu.VMEM((tm_eff, tn), jnp.float32)]
        dims = ("parallel", "parallel", "arbitrary")
    else:
        # Carry path: A^T is only consumed while j == 0; for j > 0 request the
        # last block actually fetched (nk-1) so the pipeline skips the DMA.
        def at_index_map(i, j, k):
            return (jnp.where(j == 0, k, nk - 1), 0)

        kernel = functools.partial(_lora_kernel_carry, tk=tk, x_panel=x_panel)
        in_specs = [x_spec, wt_spec, b_spec,
                    pl.BlockSpec((tk, r_pad), at_index_map),
                    bt_spec]
        operands = (xp, wt, b2, at, bt)
        scratch = [pltpu.VMEM((tm_eff, tn), jnp.float32),
                   pltpu.VMEM((tm_eff, r_pad), jnp.float32)]
        # N ("j") axis MUST stay "arbitrary": the z-carry relies on
        # lexicographic (j, k) traversal per row tile on a single core.
        dims = ("parallel", "arbitrary", "arbitrary")

    out = pl.pallas_call(
        kernel,
        out_shape=jax.ShapeDtypeStruct((m_pad, n_pad), out_dtype),
        grid_spec=pltpu.PrefetchScalarGridSpec(
            num_scalar_prefetch=0,
            grid=grid,
            in_specs=in_specs,
            out_specs=pl.BlockSpec((tm_eff, tn), lambda i, j, k: (i, j)),
            scratch_shapes=scratch,
        ),
        compiler_params=pltpu.CompilerParams(
            dimension_semantics=dims,
            vmem_limit_bytes=_VMEM_BUDGET,
        ),
    )(*operands)

    if m_pad != m or n_pad != out_f:
        out = out[:m, :out_f]
    return out.reshape(*lead, out_f)


if __name__ == "__main__":
    # Small shapes consistent with the module: batch=2, seq=8, hidden=32.
    batch, seq, in_features, out_features, rank = 2, 8, 32, 32, 4

    key = jax.random.PRNGKey(0)
    kx, kw, kb, ka, kb2, kx3, kw3, kb3, ka3, kbm3 = jax.random.split(key, 10)

    x = jax.random.normal(kx, (batch, seq, in_features), jnp.float32)

    # original_layer (nn.Linear) parameters, deterministic init in-script.
    w = jax.random.normal(kw, (out_features, in_features), jnp.float32) * 0.1
    b = jax.random.normal(kb, (out_features,), jnp.float32) * 0.1

    # LoRA params per __init__: A ~ N(0, 0.02), B = zeros.
    a = 0.02 * jax.random.normal(ka, (rank, in_features), jnp.float32)
    bmat = jnp.zeros((out_features, rank), jnp.float32)

    def ref_forward(x, w, b, a, bmat):
        return x @ w.T + b + (x @ a.T) @ bmat.T

    # Case 1: module-faithful init (B == 0) — small-M precomputed-z path.
    wt, b2, at, bt, (o_f, i_f, tn, tk) = prepare_lora_weights(w, b, a, bmat)
    out = lora_apply(x, wt, b2, at, bt, out_f=o_f, in_f=i_f, tn=tn, tk=tk)
    out = jax.block_until_ready(out)
    ref = ref_forward(x, w, b, a, bmat)
    assert out.shape == ref.shape
    err = float(jnp.max(jnp.abs(out - ref)))
    assert jnp.allclose(out, ref, atol=2e-2, rtol=2e-2), err

    # Case 2: non-zero B (as after fine-tuning), same small-M path.
    bmat2 = 0.1 * jax.random.normal(kb2, (out_features, rank), jnp.float32)
    wt2, b22, at2, bt2, (o_f2, i_f2, tn2, tk2) = prepare_lora_weights(w, b, a, bmat2)
    out2 = lora_apply(x, wt2, b22, at2, bt2, out_f=o_f2, in_f=i_f2,
                      tn=tn2, tk=tk2)
    out2 = jax.block_until_ready(out2)
    ref2 = ref_forward(x, w, b, a, bmat2)
    err2 = float(jnp.max(jnp.abs(out2 - ref2)))
    assert jnp.allclose(out2, ref2, atol=2e-2, rtol=2e-2), err2

    # Case 3: larger shapes with a small forced row tile — exercises the
    # multi-row-tile carry path (z accumulated in-kernel while j == 0,
    # reused across N tiles, K accumulated across two tiles).
    in3, out3_f, rank3 = 256, 256, 4
    x3 = jax.random.normal(kx3, (2, 32, in3), jnp.float32)
    w3 = 0.05 * jax.random.normal(kw3, (out3_f, in3), jnp.float32)
    b3 = 0.1 * jax.random.normal(kb3, (out3_f,), jnp.float32)
    a3 = 0.02 * jax.random.normal(ka3, (rank3, in3), jnp.float32)
    bm3 = 0.1 * jax.random.normal(kbm3, (out3_f, rank3), jnp.float32)
    wt3, bb3, at3, bt3, (of3, if3, tn3, tk3) = prepare_lora_weights(
        w3, b3, a3, bm3, tn=128, tk=128)
    out3 = lora_apply(x3, wt3, bb3, at3, bt3, out_f=of3, in_f=if3,
                      tm=16, tn=tn3, tk=tk3)
    out3 = jax.block_until_ready(out3)
    ref3 = ref_forward(x3, w3, b3, a3, bm3)
    err3 = float(jnp.max(jnp.abs(out3 - ref3)))
    assert jnp.allclose(out3, ref3, atol=2e-2, rtol=2e-2), err3

    print("KERNEL_OK")
</pallas_src>

<mosaic_0001>
module attributes {stable_mosaic.version = 11 : i64} {
  func.func @_lora_kernel_precomp(%arg0: i32, %arg1: i32, %arg2: i32, %arg3: memref<16x128xbf16, #tpu.memory_space<vmem>>, %arg4: memref<128x128xbf16, #tpu.memory_space<vmem>>, %arg5: memref<1x128xf32, #tpu.memory_space<vmem>>, %arg6: memref<16x128xbf16, #tpu.memory_space<vmem>>, %arg7: memref<128x128xbf16, #tpu.memory_space<vmem>>, %arg8: memref<16x128xf32, #tpu.memory_space<vmem>>, %arg9: memref<16x128xf32, #tpu.memory_space<vmem>>) attributes {dimension_semantics = [#tpu.dimension_semantics<parallel>, #tpu.dimension_semantics<parallel>, #tpu.dimension_semantics<arbitrary>], iteration_bounds = array<i64: 1, 1, 1>, scalar_prefetch = 0 : i64, scratch_operands = 1 : i64, tpu.core_type = #tpu.core_type<tc>, window_params = [{transform_indices = @transform_0, window_bounds = array<i64: 16, 128>}, {transform_indices = @transform_1, window_bounds = array<i64: 128, 128>}, {transform_indices = @transform_2, window_bounds = array<i64: 1, 128>}, {transform_indices = @transform_3, window_bounds = array<i64: 16, 128>}, {transform_indices = @transform_4, window_bounds = array<i64: 128, 128>}, {transform_indices = @transform_5, window_bounds = array<i64: 16, 128>}]} {
    %c0_i32 = arith.constant 0 : i32
    %0 = arith.cmpi eq, %arg2, %c0_i32 : i32
    %1 = arith.extui %0 : i1 to i32
    %c0_i32_0 = arith.constant 0 : i32
    %2 = arith.cmpi ne, %1, %c0_i32_0 : i32
    scf.if %2 {
      %cst_9 = arith.constant 0.000000e+00 : f32
      %15 = vector.broadcast %cst_9 : f32 to vector<16x128xf32>
      %c0_10 = arith.constant 0 : index
      %c0_11 = arith.constant 0 : index
      %16 = vector.load %arg9[%c0_10, %c0_11] : memref<16x128xf32, #tpu.memory_space<vmem>>, vector<16x128xf32>
      tpu.vector_store %arg9[%c0_10, %c0_11], %15 {strides = array<i32>} : memref<16x128xf32, #tpu.memory_space<vmem>>, vector<16x128xf32>,
    } else {
    }
    %c128_i32 = arith.constant 128 : i32
    %3 = arith.muli %arg2, %c128_i32 : i32
    %4 = tpu.assume_multiple %3, 128 : i32
    %c0 = arith.constant 0 : index
    %5 = arith.index_cast %4 : i32 to index
    %6 = vector.load %arg3[%c0, %5] : memref<16x128xbf16, #tpu.memory_space<vmem>>, vector<16x128xbf16>
    %c0_1 = arith.constant 0 : index
    %c0_2 = arith.constant 0 : index
    %7 = vector.load %arg9[%c0_1, %c0_2] : memref<16x128xf32, #tpu.memory_space<vmem>>, vector<16x128xf32>
    %c0_3 = arith.constant 0 : index
    %c0_4 = arith.constant 0 : index
    %8 = vector.load %arg4[%c0_3, %c0_4] : memref<128x128xbf16, #tpu.memory_space<vmem>>, vector<128x128xbf16>
    %cst = arith.constant dense<0.000000e+00> : vector<16x128xf32>
    %9 = tpu.matmul %6, %8, %cst {dimension_numbers = #tpu.dot_dimension_numbers<[1], [0], [0], [1], [0, 0, 1, 1], [], []>} : vector<16x128xbf16>, vector<128x128xbf16>, vector<16x128xf32> -> vector<16x128xf32>
    %10 = arith.addf %7, %9 : vector<16x128xf32>
    %c0_5 = arith.constant 0 : index
    %c0_6 = arith.constant 0 : index
    %11 = vector.load %arg9[%c0_5, %c0_6] : memref<16x128xf32, #tpu.memory_space<vmem>>, vector<16x128xf32>
    tpu.vector_store %arg9[%c0_5, %c0_6], %10 {strides = array<i32>} : memref<16x128xf32, #tpu.memory_space<vmem>>, vector<16x128xf32>,
    %c0_i32_7 = arith.constant 0 : i32
    %12 = arith.cmpi eq, %arg2, %c0_i32_7 : i32
    %13 = arith.extui %12 : i1 to i32
    %c0_i32_8 = arith.constant 0 : i32
    %14 = arith.cmpi ne, %13, %c0_i32_8 : i32
    scf.if %14 {
      %c0_9 = arith.constant 0 : index
      %c0_10 = arith.constant 0 : index
      %15 = vector.load %arg6[%c0_9, %c0_10] : memref<16x128xbf16, #tpu.memory_space<vmem>>, vector<16x128xbf16>
      %c0_11 = arith.constant 0 : index
      %c0_12 = arith.constant 0 : index
      %16 = vector.load %arg7[%c0_11, %c0_12] : memref<128x128xbf16, #tpu.memory_space<vmem>>, vector<128x128xbf16>
      %cst_13 = arith.constant dense<0.000000e+00> : vector<16x128xf32>
      %17 = tpu.matmul %15, %16, %cst_13 {dimension_numbers = #tpu.dot_dimension_numbers<[1], [0], [0], [1], [0, 0, 1, 1], [], []>} : vector<16x128xbf16>, vector<128x128xbf16>, vector<16x128xf32> -> vector<16x128xf32>
      %c0_14 = arith.constant 0 : index
      %c0_15 = arith.constant 0 : index
      %18 = vector.load %arg9[%c0_14, %c0_15] : memref<16x128xf32, #tpu.memory_space<vmem>>, vector<16x128xf32>
      %c0_16 = arith.constant 0 : index
      %c0_17 = arith.constant 0 : index
      %19 = vector.load %arg5[%c0_16, %c0_17] : memref<1x128xf32, #tpu.memory_space<vmem>>, vector<1x128xf32>
      %20 = vector.broadcast %19 : vector<1x128xf32> to vector<16x128xf32>
      %21 = arith.addf %18, %20 : vector<16x128xf32>
      %22 = arith.addf %21, %17 : vector<16x128xf32>
      %c0_18 = arith.constant 0 : index
      %c0_19 = arith.constant 0 : index
      %23 = vector.load %arg8[%c0_18, %c0_19] : memref<16x128xf32, #tpu.memory_space<vmem>>, vector<16x128xf32>
      tpu.vector_store %arg8[%c0_18, %c0_19], %22 {strides = array<i32>} : memref<16x128xf32, #tpu.memory_space<vmem>>, vector<16x128xf32>,
    } else {
    }
    return
  }
  func.func @transform_0(%arg0: i32, %arg1: i32, %arg2: i32) -> (i32, i32) {
    %c0_i32 = arith.constant 0 : i32
    %c0_i32_0 = arith.constant 0 : i32
    return %arg0, %c0_i32 : i32, i32
  }
  func.func @transform_1(%arg0: i32, %arg1: i32, %arg2: i32) -> (i32, i32) {
    %c0_i32 = arith.constant 0 : i32
    return %arg2, %arg1 : i32, i32
  }
  func.func @transform_2(%arg0: i32, %arg1: i32, %arg2: i32) -> (i32, i32) {
    %c0_i32 = arith.constant 0 : i32
    %c0_i32_0 = arith.constant 0 : i32
    return %c0_i32, %arg1 : i32, i32
  }
  func.func @transform_3(%arg0: i32, %arg1: i32, %arg2: i32) -> (i32, i32) {
    %c0_i32 = arith.constant 0 : i32
    %c0_i32_0 = arith.constant 0 : i32
    return %arg0, %c0_i32 : i32, i32
  }
  func.func @transform_4(%arg0: i32, %arg1: i32, %arg2: i32) -> (i32, i32) {
    %c0_i32 = arith.constant 0 : i32
    %c0_i32_0 = arith.constant 0 : i32
    return %c0_i32, %arg1 : i32, i32
  }
  func.func @transform_5(%arg0: i32, %arg1: i32, %arg2: i32) -> (i32, i32) {
    %c0_i32 = arith.constant 0 : i32
    return %arg0, %arg1 : i32, i32
  }
}

</mosaic_0001>

<bundles_post_ra>
// kernel: lora_apply.1
= control target key start
LH: loop header
LB: loop body
LE: loop exit
PB: predicated region body
PF: predicated region fallthrough
CT: control target
= control target key end

     0   :  { %10 = vsyncpa [#allocation4], 0  ;;  %s427_s18 = smov [#allocation3]   ;;  %s532_s0 = inlined_call_operand.vmem [shape: bf16[16,128], index: 0, kind: input, shape index: {}]   ;;  %s533_s1 = inlined_call_operand.vmem [shape: bf16[128,128], index: 1, kind: input, shape index: {}]   ;;  %s534_s2 = inlined_call_operand.hbm [shape: f32[1,128], index: 2, kind: input, shape index: {}]   ;;  %s535_s3 = inlined_call_operand.vmem [shape: bf16[16,128], index: 3, kind: input, shape index: {}]   ;;  %s536_s4 = inlined_call_operand.vmem [shape: bf16[128,128], index: 4, kind: input, shape index: {}]   ;;  %s537_s5 = inlined_call_operand.vmem [shape: f32[16,128], index: 5, kind: output, shape index: {}]  }
   0x1   :  { %s21_s19 = sshll.u32 %s427_s18, 4  ;;  %s403_s22 = scalar_lea.hbm %s534_s2, 16  ;;  %s22_s19 = int_to_ptr.vmem [resolvable:$true] %s21_s19 }
   0x2   :  { %p404_p0 = scmp.ne.s32.totalorder %s534_s2, %s403_s22  ;;  %p407_p1 = scmp.lt.u32.totalorder %s403_s22, %s534_s2 }
   0x4   :  { %p409_p2 = pnand %p407_p1, %p404_p0 }
   0x6   :  { %412 = shalt.err (!%p409_p2)
}
   0x7   :  { %s413_s27 = scalar_lea.vmem %s22_s19, 16  ;;  %s417_s28 = scalar_lea.vmem %s22_s19, 32 }
   0x8   :  { %p414_p3 = scmp.ne.s32.totalorder %s22_s19, %s413_s27  ;;  %p418_p4 = scmp.lt.s32.totalorder %s22_s19, %s22_s19 }
   0x9   :  { %p419_p5 = scmp.lt.s32.totalorder %s417_s28, %s413_s27 }
   0xb   :  { %p420_p6 = por %p419_p5, %p418_p4 }
   0xd   :  { %p421_p7 = pnand %p420_p6, %p414_p3 }
   0xf   :  { %424 = shalt.err (!%p421_p7)
}
  0x10   :  { %24 = dma.hbm_to_vmem [thread:$0]  %s534_s2, 16, %s22_s19, [#allocation4]  }
  0x11   :  { %425 = dma.done.wait [#allocation4], 16  }
  0x12   :  { %426 = vsyncadd [#allocation4], 4294967280  ;;  %v428_v0 = vmov 0.0   ;;  %vm429_vm0 = vmmov 0   ;;  %v385_v1 = vld [vmem:[%s533_s1] sm:$0xff]   ;;  %v387_v3 = vld [vmem:[%s533_s1 + $0x8] sm:$0xff]  }
  0x13   :  { %338 = vmatprep.subr.bf16.mxu1 %v428_v0  ;;  %358 = vmatprep.subr.bf16.mxu0 %v428_v0  ;;  %v386_v2 = vld [vmem:[%s536_s4] sm:$0xff]   ;;  %v388_v4 = vld [vmem:[%s536_s4 + $0x8] sm:$0xff]   ;;  %v389_v5 = vld [vmem:[%s533_s1 + $0x10] sm:$0xff]  }
  0x14   :  { %354 = vmatprep.mubr.msk.bf16.mxu1 %vm429_vm0, %v428_v0  ;;  %374 = vmatprep.mubr.msk.bf16.mxu0 %vm429_vm0, %v428_v0  ;;  %v390_v6 = vld [vmem:[%s536_s4 + $0x10] sm:$0xff]   ;;  %v391_v7 = vld [vmem:[%s533_s1 + $0x18] sm:$0xff]   ;;  %v393_v9 = vld [vmem:[%s533_s1 + $0x20] sm:$0xff]  }
  0x15   :  { %339 = vmatpush3.bf16.msra.mxu1 %v385_v1  ;;  %359 = vmatpush3.bf16.msra.mxu0 %v386_v2  ;;  %v392_v8 = vld [vmem:[%s536_s4 + $0x18] sm:$0xff]   ;;  %v394_v10 = vld [vmem:[%s536_s4 + $0x20] sm:$0xff]   ;;  %v395_v11 = vld [vmem:[%s533_s1 + $0x28] sm:$0xff]  }
  0x16   :  { %340 = vmatprep.subr.bf16.mxu1 %v428_v0  ;;  %360 = vmatprep.subr.bf16.mxu0 %v428_v0  ;;  %v396_v12 = vld [vmem:[%s536_s4 + $0x28] sm:$0xff]   ;;  %v397_v13 = vld [vmem:[%s533_s1 + $0x30] sm:$0xff]   ;;  %v399_v15 = vld [vmem:[%s533_s1 + $0x38] sm:$0xff]  }
  0x17   :  { %v398_v14 = vld [vmem:[%s536_s4 + $0x30] sm:$0xff]   ;;  %v400_v16 = vld [vmem:[%s536_s4 + $0x38] sm:$0xff]   ;;  %v401_v17 = vld [vmem:[%s532_s0] sm:$0xff]  }
  0x18   :  { %v402_v18 = vld [vmem:[%s535_s3] sm:$0xff]  }
  0x19   :  { %341 = vmatpush3.bf16.msra.mxu1 %v387_v3  ;;  %361 = vmatpush3.bf16.msra.mxu0 %v388_v4  ;;  %v319_v21 = vld [vmem:[#allocation3] ss:$0 sm:$0xff] }
  0x1a   :  { %342 = vmatprep.subr.bf16.mxu1 %v428_v0  ;;  %362 = vmatprep.subr.bf16.mxu0 %v428_v0 }
  0x1d   :  { %343 = vmatpush3.bf16.msra.mxu1 %v389_v5  ;;  %363 = vmatpush3.bf16.msra.mxu0 %v390_v6 }
  0x1e   :  { %344 = vmatprep.subr.bf16.mxu1 %v428_v0  ;;  %364 = vmatprep.subr.bf16.mxu0 %v428_v0 }
  0x21   :  { %345 = vmatpush3.bf16.msra.mxu1 %v391_v7  ;;  %365 = vmatpush3.bf16.msra.mxu0 %v392_v8 }
  0x22   :  { %346 = vmatprep.subr.bf16.mxu1 %v428_v0  ;;  %366 = vmatprep.subr.bf16.mxu0 %v428_v0 }
  0x25   :  { %347 = vmatpush3.bf16.msra.mxu1 %v393_v9  ;;  %367 = vmatpush3.bf16.msra.mxu0 %v394_v10 }
  0x26   :  { %348 = vmatprep.subr.bf16.mxu1 %v428_v0  ;;  %368 = vmatprep.subr.bf16.mxu0 %v428_v0 }
  0x29   :  { %349 = vmatpush3.bf16.msra.mxu1 %v395_v11  ;;  %369 = vmatpush3.bf16.msra.mxu0 %v396_v12 }
  0x2a   :  { %350 = vmatprep.subr.bf16.mxu1 %v428_v0  ;;  %370 = vmatprep.subr.bf16.mxu0 %v428_v0 }
  0x2d   :  { %351 = vmatpush3.bf16.msra.mxu1 %v397_v13  ;;  %371 = vmatpush3.bf16.msra.mxu0 %v398_v14 }
  0x2e   :  { %352 = vmatprep.subr.bf16.mxu1 %v428_v0  ;;  %372 = vmatprep.subr.bf16.mxu0 %v428_v0 }
  0x31   :  { %353 = vmatpush3.bf16.msra.mxu1 %v399_v15  ;;  %373 = vmatpush3.bf16.msra.mxu0 %v400_v16 }
  0x34   :  { %355 = vmatmul.mubr.bf16.vlgmr.msra.gmra.mrb[0].mxu1 %v401_v17  ;;  %375 = vmatmul.mubr.bf16.vlgmr.msra.gmra.mrb[0].mxu0 %v402_v18 }
 0x107   :  { %v152_v19 = vpop.f32.mrb[0].mxu1  ;;  %v272_v20 = vpop.f32.mrb[0].mxu0 }
 0x108   :  { %v356_v22 = vpop.f32.mrb[1].mxu1  ;;  %v378_v23 = vadd.f32 %v272_v20, %v152_v19  ;;  %v376_v24 = vpop.f32.mrb[1].mxu0 }
 0x109   :  { %v155_v25 = vpop.f32.mrb[2].mxu1  ;;  %v275_v26 = vpop.f32.mrb[2].mxu0 }
 0x10a   :  { %v357_v27 = vpop.f32.mrb[3].mxu1  ;;  %v379_v28 = vadd.f32 %v378_v23, %v319_v21  ;;  %v380_v29 = vadd.f32 %v275_v26, %v155_v25  ;;  %v377_v30 = vpop.f32.mrb[3].mxu0 }
 0x10c   :  { %292 = vst [vmem:[%s537_s5] sm:$0xff] %v379_v28  ;;  %v381_v31 = vadd.f32 %v380_v29, %v319_v21 }
 0x10e   :  { %293 = vst [vmem:[%s537_s5 + $0x8] sm:$0xff] %v381_v31 }
 0x10f   :  { %298 = vsyncpa [#allocation4], 1 }

</bundles_post_ra>
